<compile_context>
chip_gen: v5e
topology: v5e:2x2
jax: 0.10.0
libtpu: 0.0.40
codegen_flags: <defaults>
</compile_context>

<pallas_src>
import jax
import jax.numpy as jnp
from jax.experimental import pallas as pl
from jax.experimental.pallas import tpu as pltpu


def _clip_embedding_kernel(tok_ref, table_hbm, pos_ref, out_ref, gather, sems):
    # tok_ref   : (B*T,) int32 in SMEM  (scalar-prefetched token ids)
    # table_hbm : (V, D)  token embedding table, raw HBM ref (pl.ANY)
    # pos_ref   : (T, D)  position embedding, resident in VMEM
    # out_ref   : (T, D)  output block for batch element b (batch dim squeezed)
    # gather    : (T, D)  VMEM scratch receiving the gathered token rows
    # sems      : (T,)    one DMA-completion semaphore per gathered row
    b = pl.program_id(0)
    T, D = gather.shape
    V = table_hbm.shape[0]

    # Issue all T row-gather DMAs so they are in flight concurrently.
    @pl.loop(0, T)
    def _issue(t):
        tok = tok_ref[b * T + t]
        tok = jnp.clip(tok, 0, V - 1)  # guard: OOB id would otherwise DMA-fault
        pltpu.make_async_copy(
            table_hbm.at[pl.ds(tok, 1), :],
            gather.at[pl.ds(t, 1), :],
            sems.at[t],
        ).start()

    # Wait for every gather (only the transfer size matters for the wait desc).
    @pl.loop(0, T)
    def _wait(t):
        pltpu.make_async_copy(
            table_hbm.at[pl.ds(0, 1), :],
            gather.at[pl.ds(t, 1), :],
            sems.at[t],
        ).wait()

    # One dense add + one dense store per batch element.
    out_ref[...] = (gather[...] + pos_ref[...]).astype(out_ref.dtype)


def clip_embedding(tokens, token_table, pos_emb):
    """tokens: [B, T] int; token_table: [V, D]; pos_emb: [T, D] -> [B, T, D]."""
    B, T = tokens.shape
    V, D = token_table.shape
    assert pos_emb.shape == (T, D)

    # Flatten token ids to 1-D so the SMEM copy does not pad to [8, 128] words.
    tokens_flat = tokens.reshape(B * T).astype(jnp.int32)

    grid_spec = pltpu.PrefetchScalarGridSpec(
        num_scalar_prefetch=1,              # tokens -> SMEM before the grid runs
        grid=(B,),                          # one step per batch element
        in_specs=[
            pl.BlockSpec(memory_space=pl.ANY),            # token table stays in HBM
            pl.BlockSpec((T, D), lambda b, tok: (0, 0)),  # pos_emb resident (same block)
        ],
        out_specs=pl.BlockSpec((None, T, D), lambda b, tok: (b, 0, 0)),
        scratch_shapes=[
            pltpu.VMEM((T, D), token_table.dtype),        # gathered rows
            pltpu.SemaphoreType.DMA((T,)),                # one sem per row gather
        ],
    )

    itemsize = jnp.dtype(token_table.dtype).itemsize
    cost = pl.CostEstimate(
        flops=B * T * D,                                  # one add per output elem
        transcendentals=0,
        bytes_accessed=(
            B * T * 4                                     # token ids
            + B * T * D * itemsize                        # gathered table rows
            + T * D * itemsize                            # pos_emb (fetched once)
            + B * T * D * itemsize                        # output
        ),
    )

    # TODO(synk): for production CLIP, consider bf16 token_table/pos_emb in HBM
    # with an f32 upcast before the add to halve HBM gather traffic.
    return pl.pallas_call(
        _clip_embedding_kernel,
        out_shape=jax.ShapeDtypeStruct((B, T, D), token_table.dtype),
        grid_spec=grid_spec,
        compiler_params=pltpu.CompilerParams(
            dimension_semantics=("parallel",),  # batch axis -> v7x megacore sharding
        ),
        cost_estimate=cost,
    )(tokens_flat, token_table, pos_emb)


if __name__ == "__main__":
    # Small synthetic shapes consistent with the module:
    #   n_vocab=64, d_embed=32, n_tokens=8, batch=2
    n_vocab, d_embed, n_tokens, batch = 64, 32, 8, 2

    key = jax.random.PRNGKey(0)
    k_tok, k_table, k_pos = jax.random.split(key, 3)

    # nn.Embedding default init ~ N(0,1); position_embedding is zeros in the
    # module -- use a small deterministic non-zero init so the add is exercised.
    token_table = jax.random.normal(k_table, (n_vocab, d_embed), dtype=jnp.float32)
    pos_emb = 0.01 * jax.random.normal(k_pos, (n_tokens, d_embed), dtype=jnp.float32)
    tokens = jax.random.randint(k_tok, (batch, n_tokens), 0, n_vocab, dtype=jnp.int32)

    out = clip_embedding(tokens, token_table, pos_emb)
    out = jax.block_until_ready(out)

    # Pure-JAX reference: token_embedding(tokens) + position_embedding
    ref = token_table[tokens] + pos_emb[None, :, :]

    assert out.shape == (batch, n_tokens, d_embed)
    assert out.dtype == jnp.float32
    assert jnp.allclose(out, ref, atol=1e-6, rtol=1e-6)

    print("KERNEL_OK")
</pallas_src>

<mosaic_0001>
module attributes {stable_mosaic.version = 11 : i64} {
  func.func @_clip_embedding_kernel(%arg0: i32, %arg1: memref<16xi32, #tpu.memory_space<smem>>, %arg2: memref<64x32xf32, #tpu.memory_space<any>>, %arg3: memref<8x32xf32, #tpu.memory_space<vmem>>, %arg4: memref<1x8x32xf32, #tpu.memory_space<vmem>>, %arg5: memref<8x32xf32, #tpu.memory_space<vmem>>, %arg6: memref<8x!tpu.dma_semaphore, #tpu.memory_space<semaphore_mem>>) attributes {dimension_semantics = [#tpu.dimension_semantics<parallel>], iteration_bounds = array<i64: 2>, scalar_prefetch = 1 : i64, scratch_operands = 2 : i64, tpu.core_type = #tpu.core_type<tc>, window_params = [{}, {pipeline_mode = #tpu.pipeline_mode<synchronous>, transform_indices = @transform_1, window_bounds = array<i64: 8, 32>}, {transform_indices = @transform_2, window_bounds = array<i64: 1, 8, 32>}]} {
    %c0_i32 = arith.constant 0 : i32
    %c8_i32 = arith.constant 8 : i32
    %0 = arith.addi %c0_i32, %c8_i32 : i32
    %c1_i32 = arith.constant 1 : i32
    scf.for %arg7 = %c0_i32 to %0 step %c1_i32  : i32 {
      %c1_i32_11 = arith.constant 1 : i32
      %8 = arith.muli %arg7, %c1_i32_11 : i32
      %c0_i32_12 = arith.constant 0 : i32
      %9 = arith.addi %c0_i32_12, %8 : i32
      %c8_i32_13 = arith.constant 8 : i32
      %10 = arith.muli %arg0, %c8_i32_13 : i32
      %11 = arith.addi %10, %9 : i32
      %12 = arith.index_cast %11 : i32 to index
      %13 = memref.load %arg1[%12] : memref<16xi32, #tpu.memory_space<smem>>
      %c0_i32_14 = arith.constant 0 : i32
      %c63_i32 = arith.constant 63 : i32
      %14 = arith.maxsi %c0_i32_14, %13 : i32
      %15 = arith.minsi %c63_i32, %14 : i32
      %c0_i32_15 = arith.constant 0 : i32
      %16 = tpu.memref_slice %arg2[%15, %c0_i32_15] : memref<64x32xf32, #tpu.memory_space<any>> -> memref<1x32xf32, #tpu.memory_space<any>>
      %c0_i32_16 = arith.constant 0 : i32
      %17 = tpu.memref_slice %arg5[%9, %c0_i32_16] : memref<8x32xf32, #tpu.memory_space<vmem>> -> memref<1x32xf32, #tpu.memory_space<vmem>>
      %18 = tpu.memref_slice %arg6[%9] : memref<8x!tpu.dma_semaphore, #tpu.memory_space<semaphore_mem>> -> memref<1x!tpu.dma_semaphore, #tpu.memory_space<semaphore_mem>>
      %19 = tpu.memref_squeeze %18 : memref<1x!tpu.dma_semaphore, #tpu.memory_space<semaphore_mem>> -> memref<!tpu.dma_semaphore, #tpu.memory_space<semaphore_mem>>
      tpu.enqueue_dma source(%16 : memref<1x32xf32, #tpu.memory_space<any>>) target(%17 : memref<1x32xf32, #tpu.memory_space<vmem>>) target_semaphore(%19 : memref<!tpu.dma_semaphore, #tpu.memory_space<semaphore_mem>>)
    }
    %c8_i32_0 = arith.constant 8 : i32
    %c0_i32_1 = arith.constant 0 : i32
    %c8_i32_2 = arith.constant 8 : i32
    %1 = arith.addi %c0_i32_1, %c8_i32_2 : i32
    %c1_i32_3 = arith.constant 1 : i32
    scf.for %arg7 = %c0_i32_1 to %1 step %c1_i32_3  : i32 {
      %c1_i32_11 = arith.constant 1 : i32
      %8 = arith.muli %arg7, %c1_i32_11 : i32
      %c0_i32_12 = arith.constant 0 : i32
      %9 = arith.addi %c0_i32_12, %8 : i32
      %c0_i32_13 = arith.constant 0 : i32
      %c0_i32_14 = arith.constant 0 : i32
      %10 = tpu.memref_slice %arg2[%c0_i32_13, %c0_i32_14] : memref<64x32xf32, #tpu.memory_space<any>> -> memref<1x32xf32, #tpu.memory_space<any>>
      %c0_i32_15 = arith.constant 0 : i32
      %11 = tpu.memref_slice %arg5[%9, %c0_i32_15] : memref<8x32xf32, #tpu.memory_space<vmem>> -> memref<1x32xf32, #tpu.memory_space<vmem>>
      %12 = tpu.memref_slice %arg6[%9] : memref<8x!tpu.dma_semaphore, #tpu.memory_space<semaphore_mem>> -> memref<1x!tpu.dma_semaphore, #tpu.memory_space<semaphore_mem>>
      %13 = tpu.memref_squeeze %12 : memref<1x!tpu.dma_semaphore, #tpu.memory_space<semaphore_mem>> -> memref<!tpu.dma_semaphore, #tpu.memory_space<semaphore_mem>>
      tpu.wait_dma2 semaphore(%13 : memref<!tpu.dma_semaphore, #tpu.memory_space<semaphore_mem>>) src(%10 : memref<1x32xf32, #tpu.memory_space<any>>) dst(%11 : memref<1x32xf32, #tpu.memory_space<vmem>>)
    }
    %c8_i32_4 = arith.constant 8 : i32
    %c0 = arith.constant 0 : index
    %c0_5 = arith.constant 0 : index
    %2 = vector.load %arg5[%c0, %c0_5] : memref<8x32xf32, #tpu.memory_space<vmem>>, vector<8x32xf32>
    %c0_6 = arith.constant 0 : index
    %c0_7 = arith.constant 0 : index
    %3 = vector.load %arg3[%c0_6, %c0_7] : memref<8x32xf32, #tpu.memory_space<vmem>>, vector<8x32xf32>
    %4 = arith.addf %2, %3 : vector<8x32xf32>
    %c0_8 = arith.constant 0 : index
    %c0_9 = arith.constant 0 : index
    %c0_10 = arith.constant 0 : index
    %5 = vector.load %arg4[%c0_8, %c0_9, %c0_10] : memref<1x8x32xf32, #tpu.memory_space<vmem>>, vector<1x8x32xf32>
    %6 = vector.shape_cast %5 : vector<1x8x32xf32> to vector<8x32xf32>
    %7 = vector.shape_cast %4 : vector<8x32xf32> to vector<1x8x32xf32>
    tpu.vector_store %arg4[%c0_8, %c0_9, %c0_10], %7 {strides = array<i32>} : memref<1x8x32xf32, #tpu.memory_space<vmem>>, vector<1x8x32xf32>,
    return
  }
  func.func @transform_1(%arg0: i32, %arg1: memref<16xi32, #tpu.memory_space<smem>>) -> (i32, i32) {
    %c0_i32 = arith.constant 0 : i32
    %c0_i32_0 = arith.constant 0 : i32
    %c0_i32_1 = arith.constant 0 : i32
    return %c0_i32, %c0_i32_0 : i32, i32
  }
  func.func @transform_2(%arg0: i32, %arg1: memref<16xi32, #tpu.memory_space<smem>>) -> (i32, i32, i32) {
    %c0_i32 = arith.constant 0 : i32
    %c0_i32_0 = arith.constant 0 : i32
    %c0_i32_1 = arith.constant 0 : i32
    return %arg0, %c0_i32, %c0_i32_0 : i32, i32, i32
  }
}

</mosaic_0001>

<bundles_post_ra>
// kernel: tpu_custom_call.1
= control target key start
LH: loop header
LB: loop body
LE: loop exit
PB: predicated region body
PF: predicated region fallthrough
CT: control target
= control target key end

     0   :  { %s482_s15 = smov [#allocation5]   ;;  %s607_s0 = inlined_call_operand.vmem [shape: s32[16], index: 0, kind: input, shape index: {}]   ;;  %s608_s1 = inlined_call_operand.vmem [shape: f32[64,32], index: 1, kind: input, shape index: {}]   ;;  %s609_s2 = inlined_call_operand.vmem [shape: f32[8,32], index: 2, kind: input, shape index: {}]   ;;  %s610_s3 = inlined_call_operand.hbm [shape: f32[2,8,32], index: 3, kind: output, shape index: {}]  }
   0x1   :  { %s9_s14 = sshll.u32 %s607_s0, 4  ;;  %s10_s14 = int_to_ptr.vmem [resolvable:$true] %s9_s14 }
   0x2   :  { %12 = dma.vmem_to_smem %s10_s14, 16, %s482_s15, [#allocation4] }
   0x3   :  { %450 = dma.done.wait [#allocation4], 16 }
   0x4   :  { %451 = vsyncadd [#allocation4], 4294967280 }
   0x5   :  { %15 = sfence }
   0x6   :  { %16 = vsyncpa [#allocation7], 0 }
   0x7   :  { %18 = vsyncpa [#allocation7 + $0x1], 0  ;;  %s506_s16 = smov 0   ;;  %s508_s17 = smov 0  }
   0x8   :  { %s510_s18 = smov 0   ;;  %s512_s19 = smov 0  }
   0x9 LB: > { %s305_s0 = sadd.s32 4294967295, %s472_s19   ;;  %s306_s20 = sadd.s32 4294967294, %s472_s19   ;;  %s472_s19 = sphi %s512_s19, %s616_s19   ;;  %s468_s18 = sphi %s510_s18, %s615_s18   ;;  %s464_s17 = sphi %s508_s17, %s614_s17   ;;  %s460_s16 = sphi %s506_s16, %s613_s16  }
   0xa   : > { %s529_s21 = sadd.s32 1, %s472_s19   ;;  %s52_s22 = sadd.s32 1, %s468_s18 }
   0xb   : > { %s49_s23 = ssub.s32 %s472_s19, %s529_s21  ;;  %p62_p0 = scmp.ne.s32.totalorder %s468_s18, %s464_s17 }
   0xc   : > { %p50_p1 = scmp.eq.s32.totalorder %s49_s23, 0  ;;  %p63_p2 = scmp.eq.s32.totalorder %s305_s0, 1 }
   0xd   : > { %p68_p3 = scmp.ne.s32.totalorder %s464_s17, %s460_s16  ;;  %p69_p4 = scmp.eq.s32.totalorder %s306_s20, 1 }
   0xe   : > { %s541_s24 = scalar_select %p50_p1, %s468_s18, %s52_s22  }
   0xf   : > { %p543_p5 = por %p63_p2, %p62_p0  ;;  %p547_p6 = por %p69_p4, %p68_p3 }
  0x10   : > { %p308_p7 = scmp.ge.s32.totalorder %s472_s19, 1  ;;  %p90_p8 = scmp.lt.s32.totalorder %s472_s19, 3 }
  0x12   : > { %p91_p9 = pnand %p308_p7, %p90_p8 }
  0x13   : > { %s102_s27 = sand.u32 (!%p91_p9), 1, %s464_s17   ;;  %s474_s30 = smov (!%p91_p9), 0  }
  0x14   : > { %94 = sbr.rel (%p91_p9) target bundleno = 66 (0x42), region = 24  ;;  %s556_s28 = sshll.u32 (!%p91_p9), %s102_s27, 3 }
  0x15   : > { %s104_s29 = scalar_lea.vmem (!%p91_p9), [#allocation6], %s556_s28 }
  0x19 LB: >> { %s561_s4 = sshll.u32 %s305_s0, 3  ;;  %s119_s10 = scalar_lea.vmem [#allocation2], %s476_s30  ;;  %s476_s30 = sphi %s474_s30, %s110_s30  }
  0x1a   : >> { %s112_s5 = sadd.s32 %s476_s30, %s561_s4  ;;  %s120_s11 = scalar_lea.sflag [#allocation3], %s476_s30 }
  0x1b   : >> { %s113_s6 = sld [smem:[#allocation5 + %s112_s5]] }
  0x21   : >> { %p114_p10 = scmp.gt.s32.totalorder %s113_s6, 0  ;;  %p311_p11 = scmp.lt.s32.totalorder %s113_s6, 63 }
  0x23   : >> { %s618_s6 = smov (!%p114_p10, %s113_s6), 0 }
  0x24   : >> { %s620_s6 = smov (!%p311_p11, %s618_s6), 63 }
  0x25   : >> { %s118_s9 = scalar_lea.vmem %s608_s1, %s620_s6 }
  0x26   : >> { %v135_v0 = vld [vmem:[%s118_s9] sm:$0x1] }
  0x27   : >> { %136 = vst [vmem:[%s119_s10] sm:$0x1] %v135_v0 }
  0x28   : >> { %154 = vsyncadd %s120_s11, 16  ;;  %s110_s30 = sadd.s32 1, %s476_s30  }
  0x29   : >> { %p107_p12 = scmp.ge.s32.totalorder %s110_s30, 8  }
  0x2a   : > { %s478_s12 = smov (%p107_p12), 0  }
  0x2b   : > { %109 = sbr.rel (!%p107_p12) target bundleno = 25 (0x19), region = 115 }
  0x30 LB: >> { %s161_s13 = scalar_lea.sflag [#allocation3], %s480_s12  ;;  %s480_s12 = sphi %s478_s12, %s160_s12  }
  0x31   : >> { %452 = dma.done.wait %s161_s13, 16 }
  0x32   : >> { %453 = vsyncadd %s161_s13, 4294967280  ;;  %s160_s12 = sadd.s32 1, %s480_s12  }
  0x33   : >> { %p157_p13 = scmp.ge.s32.totalorder %s160_s12, 8  }
  0x34   : > { %v165_v1 = vld [vmem:[#allocation2] sm:$0xff] (%p157_p13)  ;;  %vm168_vm0 = vcmask (%p157_p13), 261120   ;;  %s181_s22 = scalar_lea.hbm (%p157_p13), %s610_s3, %s561_s4  ;;  %s183_s23 = sshll.u32 (%p157_p13), %s104_s29, 4  ;;  %s184_s23 = int_to_ptr.vmem [resolvable:$true] %s183_s23 }
  0x35   : > { %159 = sbr.rel (!%p157_p13) target bundleno = 48 (0x30), region = 126  ;;  %v166_v2 = vld [vmem:[%s609_s2] sm:$0xff] (%p157_p13)  ;;  %s185_s30 = sshll.u32 (%p157_p13), %s181_s22, 4  ;;  %s186_s30 = int_to_ptr.hbm [resolvable:$true] %s185_s30 }
  0x36   : > { %v167_v3 = vadd.f32 (%p157_p13), %v166_v2, %v165_v1  ;;  %s171_s5 = scalar_lea.sflag (%p157_p13), [#allocation7], %s102_s27  ;;  %s412_s6 = sshra.s32 (%p157_p13), %s186_s30, 4  ;;  %s413_s6 = int_to_ptr.hbm [resolvable:$true] %s412_s6 }
  0x37   : > { %s414_s7 = scalar_lea.hbm (%p157_p13), %s413_s6, 8  ;;  %s418_s4 = scalar_lea.hbm (%p157_p13), %s610_s3, 16 }
  0x38   : > { %169 = vst.msk [vmem:[%s104_s29] sm:$0xff] (%p157_p13), %vm168_vm0, %v167_v3  ;;  %p415_p0 = scmp.ne.s32.totalorder (%p157_p13), %s413_s6, %s414_s7  ;;  %p419_p3 = scmp.lt.s32.totalorder (%p157_p13), %s413_s6, %s610_s3 }
  0x39   : > { %p420_p4 = scmp.lt.s32.totalorder (%p157_p13), %s418_s4, %s414_s7 }
  0x3a   : > { %p416_p1 = pnand %p415_p0, %p543_p5 }
  0x3b   : > { %p421_p7 = por %p420_p4, %p419_p3 }
  0x3c   : > { %p417_p2 = pneg %p416_p1 }
  0x3e   : > { %p422_p8 = pnand %p421_p7, %p417_p2 }
  0x40   : > { %425 = shalt.err (!%p422_p8)
}
  0x41   : > { %330 = dma.vmem_to_hbm [thread:$0]  (%p543_p5), %s184_s23, 128, %s186_s30, %s171_s5  }
  0x42 PF: > { %p336_p9 = scmp.ge.s32.totalorder %s472_s19, 2  ;;  %s197_s27 = sand.u32 1, %s460_s16  }
  0x43   : > { %s198_s28 = scalar_lea.sflag [#allocation7], %s197_s27 }
  0x44   : > { %p333_p10 = pnand %p336_p9, %p547_p6 }
  0x46   : > { %p334_p11 = pneg %p333_p10 }
  0x48   : > { %455 = dma.done.wait (%p334_p11), %s198_s28, 128  }
  0x49   : > { %457 = vsyncadd (%p334_p11), %s198_s28, 4294967168  ;;  %p21_p12 = scmp.ge.s32.totalorder %s529_s21, 4   ;;  %s613_s16 = smov %s464_s17 }
  0x4a   : > { %s614_s17 = smov %s468_s18  ;;  %s615_s18 = smov %s541_s24 }
  0x4b   : > { %s616_s19 = smov %s529_s21  ;;  %23 = sbr.rel (!%p21_p12) target bundleno = 9 (0x9), region = 137 }
  0x50   :  { %204 = vsyncpa [#allocation7], 1 }
  0x51   :  { %206 = vsyncpa [#allocation7 + $0x1], 1 }
  0x52   :  { %207 = vsyncmov [#allocation3] }
  0x55   :  { %s208_s19 = vpop.sfrf %207 }
  0x56   :  { %p320_p5 = scmp.ne.s32.totalorder %s208_s19, 0 }
  0x58   :  { %212 = shalt.err (%p320_p5)  }
  0x59   :  { %214 = vsyncmov [#allocation3 + $0x1] }
  0x5c   :  { %s215_s25 = vpop.sfrf %214 }
  0x5d   :  { %p321_p6 = scmp.ne.s32.totalorder %s215_s25, 0 }
  0x5f   :  { %219 = shalt.err (%p321_p6)  }
  0x60   :  { %221 = vsyncmov [#allocation3 + $0x2] }
  0x63   :  { %s222_s26 = vpop.sfrf %221 }
  0x64   :  { %p322_p13 = scmp.ne.s32.totalorder %s222_s26, 0 }
  0x66   :  { %226 = shalt.err (%p322_p13)  }
  0x67   :  { %228 = vsyncmov [#allocation3 + $0x3] }
  0x6a   :  { %s229_s29 = vpop.sfrf %228 }
  0x6b   :  { %p323_p0 = scmp.ne.s32.totalorder %s229_s29, 0 }
  0x6d   :  { %233 = shalt.err (%p323_p0)  }
  0x6e   :  { %235 = vsyncmov [#allocation3 + $0x4] }
  0x71   :  { %s236_s21 = vpop.sfrf %235 }
  0x72   :  { %p324_p1 = scmp.ne.s32.totalorder %s236_s21, 0 }
  0x74   :  { %240 = shalt.err (%p324_p1)  }
  0x75   :  { %242 = vsyncmov [#allocation3 + $0x5] }
  0x78   :  { %s243_s1 = vpop.sfrf %242 }
  0x79   :  { %p325_p2 = scmp.ne.s32.totalorder %s243_s1, 0 }
  0x7b   :  { %247 = shalt.err (%p325_p2)  }
  0x7c   :  { %249 = vsyncmov [#allocation3 + $0x6] }
  0x7f   :  { %s250_s2 = vpop.sfrf %249 }
  0x80   :  { %p326_p3 = scmp.ne.s32.totalorder %s250_s2, 0 }
  0x82   :  { %254 = shalt.err (%p326_p3)  }
  0x83   :  { %256 = vsyncmov [#allocation3 + $0x7] }
  0x86   :  { %s257_s3 = vpop.sfrf %256 }
  0x87   :  { %p327_p4 = scmp.ne.s32.totalorder %s257_s3, 0 }
  0x89   :  { %261 = shalt.err (%p327_p4)  }

</bundles_post_ra>
